<compile_context>
chip_gen: v5e
topology: v5e:2x2
jax: 0.10.0
libtpu: 0.0.40
codegen_flags: <defaults>
</compile_context>

<pallas_src>
import functools
import math

import jax
import jax.numpy as jnp
from jax.experimental import pallas as pl
from jax.experimental.pallas import tpu as pltpu


# --------------------------------------------------------------------------
# Kernels
# --------------------------------------------------------------------------
def _lora_a_kernel(x_ref, at_ref, ba_ref, xa_ref, acc_ref):
    """LoRA A path: xa = x @ A^T + b_a.   Grid = (M-tiles, K-tiles).

    x_ref  : (tm, tk)      activation tile (compute dtype)
    at_ref : (tk, r_pad)   LoRA A weight, transposed, rank zero-padded
    ba_ref : (1, r_pad)    LoRA A bias (f32, zero padded)
    xa_ref : (tm, r_pad)   output tile (compute dtype)
    acc_ref: (tm, r_pad)   f32 accumulator (scratch)
    """
    k = pl.program_id(1)

    @pl.when(k == 0)
    def _():
        acc_ref[...] = jnp.zeros_like(acc_ref)

    acc_ref[...] += jnp.dot(x_ref[...], at_ref[...],
                            preferred_element_type=jnp.float32)

    @pl.when(k == pl.num_programs(1) - 1)
    def _():
        xa_ref[...] = (acc_ref[...] + ba_ref[...]).astype(xa_ref.dtype)


def _lora_linear_kernel(x_ref, wot_ref, xa_ref, bt_ref, bias_ref,
                        o_ref, acc_ref):
    """Main path.   Grid = (M-tiles, N-tiles, K-tiles); K innermost.

    x_ref    : (tm, tk)     activation tile (compute dtype)
    wot_ref  : (tk, tn)     original weight, transposed, tile
    xa_ref   : (tm, r_pad)  precomputed LoRA A output (x @ A^T + b_a)
    bt_ref   : (r_pad, tn)  LoRA B weight, transposed, rank zero-padded
    bias_ref : (1, tn)      fused output bias (b_orig + b_b), f32
    o_ref    : (tm, tn)     output tile
    acc_ref  : (tm, tn) f32 accumulator (scratch)

    xa/bt/bias block indices are constant across k (and xa also across j), so
    Pallas only DMAs them when the block index actually changes.
    """
    k = pl.program_id(2)

    @pl.when(k == 0)
    def _():
        acc_ref[...] = jnp.zeros_like(acc_ref)

    acc_ref[...] += jnp.dot(x_ref[...], wot_ref[...],
                            preferred_element_type=jnp.float32)

    @pl.when(k == pl.num_programs(2) - 1)
    def _():
        # Fused epilogue: LoRA B matmul + bias + store in one expression.
        o_ref[...] = (acc_ref[...]
                      + jnp.dot(xa_ref[...], bt_ref[...],
                                preferred_element_type=jnp.float32)
                      + bias_ref[...]).astype(o_ref.dtype)


# --------------------------------------------------------------------------
# Parameter preparation (once, outside jit)
# --------------------------------------------------------------------------
def prepare_lora_params(w_orig, b_orig, w_a, b_a, w_b, b_b, *,
                        compute_dtype=None):
    """One-time weight preparation.

    PyTorch nn.Linear layout (out, in) -> transposed (in, out); LoRA rank
    zero-padded to a multiple of 128 lanes; the two output biases folded into
    one; weights optionally cast to a low-precision compute dtype (bf16).
    """
    d_out, d_in = w_orig.shape
    r = w_a.shape[0]
    r_pad = max(128, ((r + 127) // 128) * 128)
    dt = jnp.dtype(compute_dtype) if compute_dtype is not None else w_orig.dtype

    wot = jnp.asarray(w_orig.T, dt)                                   # (d_in, d_out)
    at = jnp.zeros((d_in, r_pad), dt).at[:, :r].set(w_a.T.astype(dt))
    bt = jnp.zeros((r_pad, d_out), dt).at[:r, :].set(w_b.T.astype(dt))
    ba = jnp.zeros((1, r_pad), jnp.float32).at[:, :r].set(b_a.astype(jnp.float32))
    bias = (b_orig.astype(jnp.float32) + b_b.astype(jnp.float32)).reshape(1, d_out)
    return wot, at, bt, ba, bias


# --------------------------------------------------------------------------
# Tiling helpers
# --------------------------------------------------------------------------
def _pick_tile(dim, pref, max_full=2048):
    """Largest 128-aligned divisor of `dim` that is <= pref (prefers 256-aligned).

    Never silently falls back to an arbitrarily large full dimension: the full
    dim is only used if it is small enough to be a single VMEM-friendly tile.
    """
    if dim <= pref:
        return dim
    for align in (256, 128):          # 256-aligned preferred (v6e/v7x 2x256^2 MXU)
        t = (pref // align) * align
        while t >= align:
            if dim % t == 0:
                return t
            t -= align
    if dim <= max_full:
        return dim
    raise ValueError(
        f"Dimension {dim} has no 128-aligned tile <= {pref} and exceeds "
        f"{max_full}; zero-pad it to a multiple of 128 before calling lora_linear.")


def _pick_m_tile(m, pref):
    """Return (tile, padded_m).  Prefers a multiple-of-8 divisor of m so no
    activation padding / output re-slice is needed; pads only as a fallback."""
    if m <= pref:
        return m, m
    t = (pref // 8) * 8
    t_min = max(64, ((pref // 4) // 8) * 8)
    while t >= t_min:
        if m % t == 0:
            return t, m
        t -= 8
    t = (pref // 8) * 8
    return t, ((m + t - 1) // t) * t


@functools.lru_cache(maxsize=None)
def _vmem_capacity_bytes():
    """Per-core VMEM capacity (generation-aware), conservative fallback."""
    try:
        info = pltpu.get_tpu_info()
        cap = int(getattr(info, "vmem_capacity_bytes", 0))
        if cap > 0:
            return cap
    except Exception:
        pass
    return 64 * 1024 * 1024   # v7x per-TensorCore VMEM (smallest of the fleet)


# --------------------------------------------------------------------------
# Wrapper
# --------------------------------------------------------------------------
@functools.partial(jax.jit, static_argnames=("tm", "tn", "tk"))
def lora_linear(x, wot, at, bt, ba, bias, *, tm=512, tn=1024, tk=1024):
    """out = x @ W_o^T + b_o + (x @ A^T + b_a) @ B^T + b_b,   x: (..., d_in)."""
    # TODO(synk): the optional LayerNorm before the LoRA path is nn.Identity()
    # here (the PyTorch default when layer_norm=None).
    *lead, d_in = x.shape
    assert d_in == wot.shape[0], "x feature dim must match prepared weights"
    d_out = wot.shape[1]
    r_pad = at.shape[1]
    m = math.prod(lead) if lead else 1

    x2 = x.reshape(m, d_in).astype(wot.dtype)

    tm_, m_p = _pick_m_tile(m, tm)
    tk_ = _pick_tile(d_in, tk)
    tn_ = _pick_tile(d_out, tn)

    if m_p != m:
        x2 = jnp.pad(x2, ((0, m_p - m), (0, 0)))

    w_item = jnp.dtype(wot.dtype).itemsize
    o_item = jnp.dtype(x.dtype).itemsize

    # VMEM budget (double-buffered inputs/outputs + f32 accumulator), with a
    # generation-aware cap (~48 MiB on v7x, ~96 MiB on v5e/v6e).
    vmem_est = (2 * (tm_ * tk_ + tk_ * tn_ + tm_ * r_pad + r_pad * tn_) * w_item
                + 2 * tn_ * 4
                + 2 * tm_ * tn_ * o_item
                + tm_ * tn_ * 4)
    vmem_cap = _vmem_capacity_bytes()
    vmem_limit = int(min(max(32 * 1024 * 1024, 2 * vmem_est),
                         int(0.75 * vmem_cap)))

    # --- Pass 1: LoRA A path (tiny rank matmul), xa = x @ A^T + b_a ---------
    xa = pl.pallas_call(
        _lora_a_kernel,
        out_shape=jax.ShapeDtypeStruct((m_p, r_pad), wot.dtype),
        grid_spec=pltpu.PrefetchScalarGridSpec(
            num_scalar_prefetch=0,
            grid=(m_p // tm_, d_in // tk_),
            in_specs=[
                pl.BlockSpec((tm_, tk_), lambda i, k: (i, k)),      # x tile
                pl.BlockSpec((tk_, r_pad), lambda i, k: (k, 0)),    # A^T
                pl.BlockSpec((1, r_pad), lambda i, k: (0, 0)),      # b_a
            ],
            out_specs=pl.BlockSpec((tm_, r_pad), lambda i, k: (i, 0)),
            scratch_shapes=[pltpu.VMEM((tm_, r_pad), jnp.float32)],
        ),
        compiler_params=pltpu.CompilerParams(
            dimension_semantics=("parallel", "arbitrary"),
            vmem_limit_bytes=vmem_limit),
        cost_estimate=pl.CostEstimate(
            flops=2 * m_p * d_in * r_pad, transcendentals=0,
            bytes_accessed=(m_p * d_in + d_in * r_pad + m_p * r_pad) * w_item),
    )(x2, at, ba)

    # --- Pass 2: main matmul + fused LoRA-B / bias epilogue -----------------
    grid = (m_p // tm_, d_out // tn_, d_in // tk_)
    flops = 2 * m_p * d_out * (d_in + r_pad)
    bytes_accessed = ((m_p * d_in + d_in * d_out + m_p * r_pad + r_pad * d_out) * w_item
                      + d_out * 4 + m_p * d_out * o_item)

    out2 = pl.pallas_call(
        _lora_linear_kernel,
        out_shape=jax.ShapeDtypeStruct((m_p, d_out), x.dtype),
        grid_spec=pltpu.PrefetchScalarGridSpec(
            num_scalar_prefetch=0,
            grid=grid,
            in_specs=[
                pl.BlockSpec((tm_, tk_), lambda i, j, k: (i, k)),    # x tile
                pl.BlockSpec((tk_, tn_), lambda i, j, k: (k, j)),    # W_o^T
                pl.BlockSpec((tm_, r_pad), lambda i, j, k: (i, 0)),  # xa (resident)
                pl.BlockSpec((r_pad, tn_), lambda i, j, k: (0, j)),  # B^T
                pl.BlockSpec((1, tn_), lambda i, j, k: (0, j)),      # fused bias
            ],
            out_specs=pl.BlockSpec((tm_, tn_), lambda i, j, k: (i, j)),
            scratch_shapes=[pltpu.VMEM((tm_, tn_), jnp.float32)],
        ),
        compiler_params=pltpu.CompilerParams(
            dimension_semantics=("parallel", "parallel", "arbitrary"),
            vmem_limit_bytes=vmem_limit),
        cost_estimate=pl.CostEstimate(flops=flops, transcendentals=0,
                                      bytes_accessed=bytes_accessed),
    )(x2, wot, xa, bt, bias)

    if m_p != m:
        out2 = out2[:m]
    return out2.reshape(*lead, d_out)


# --------------------------------------------------------------------------
# Reference + tests
# --------------------------------------------------------------------------
def _reference(x, w_orig, b_orig, w_a, b_a, w_b, b_b):
    orig = jnp.einsum("bsd,od->bso", x, w_orig) + b_orig
    a = jnp.einsum("bsd,rd->bsr", x, w_a) + b_a
    lora = jnp.einsum("bsr,or->bso", a, w_b) + b_b
    return orig + lora


if __name__ == "__main__":
    # Small shapes consistent with the module's forward: (batch, seq, in_features).
    batch, seq = 2, 8
    in_features, out_features, rank = 32, 32, 4

    key = jax.random.PRNGKey(0)
    kx, kwo, kbo, kwa, kba, kwb, kbb = jax.random.split(key, 7)

    x = jax.random.normal(kx, (batch, seq, in_features), jnp.float32)
    # nn.Linear layout: (out_features, in_features).
    w_orig = jax.random.normal(kwo, (out_features, in_features), jnp.float32) * 0.05
    b_orig = jax.random.normal(kbo, (out_features,), jnp.float32) * 0.05
    w_a = jax.random.normal(kwa, (rank, in_features), jnp.float32) * 0.05
    b_a = jax.random.normal(kba, (rank,), jnp.float32) * 0.05
    w_b = jax.random.normal(kwb, (out_features, rank), jnp.float32) * 0.05
    b_b = jax.random.normal(kbb, (out_features,), jnp.float32) * 0.05

    # f32 run (single tile per grid axis at these small shapes).
    params = prepare_lora_params(w_orig, b_orig, w_a, b_a, w_b, b_b)
    out = jax.block_until_ready(lora_linear(x, *params))
    ref = _reference(x, w_orig, b_orig, w_a, b_a, w_b, b_b)
    assert out.shape == (batch, seq, out_features)
    assert jnp.allclose(out, ref, atol=1e-4, rtol=1e-4), "f32 mismatch vs reference"

    # bf16 weights + activations (halved HBM traffic, 2x MXU throughput).
    params_bf16 = prepare_lora_params(w_orig, b_orig, w_a, b_a, w_b, b_b,
                                      compute_dtype=jnp.bfloat16)
    out_bf16 = jax.block_until_ready(
        lora_linear(x.astype(jnp.bfloat16), *params_bf16))
    assert jnp.allclose(out_bf16.astype(jnp.float32), ref,
                        atol=5e-2, rtol=5e-2), "bf16 mismatch vs reference"

    # Multi-tile sanity check: (3, 3, 2) main grid with M padding (m=314 has no
    # nice divisor) so the K accumulation, N parallel tiles, the hoisted A path
    # and the M-padding fallback are all exercised.
    kx2, kwo2, kwa2, kwb2 = jax.random.split(jax.random.PRNGKey(1), 4)
    b2, s2, din2, dout2, r2 = 2, 157, 512, 384, 8
    x_big = jax.random.normal(kx2, (b2, s2, din2), jnp.float32)
    w_orig2 = jax.random.normal(kwo2, (dout2, din2), jnp.float32) * 0.05
    b_orig2 = jax.random.normal(kbo, (dout2,), jnp.float32) * 0.05
    w_a2 = jax.random.normal(kwa2, (r2, din2), jnp.float32) * 0.05
    b_a2 = jax.random.normal(kba, (r2,), jnp.float32) * 0.05
    w_b2 = jax.random.normal(kwb2, (dout2, r2), jnp.float32) * 0.05
    b_b2 = jax.random.normal(kbb, (dout2,), jnp.float32) * 0.05

    params2 = prepare_lora_params(w_orig2, b_orig2, w_a2, b_a2, w_b2, b_b2)
    out_big = jax.block_until_ready(
        lora_linear(x_big, *params2, tm=128, tn=256, tk=256))
    ref_big = _reference(x_big, w_orig2, b_orig2, w_a2, b_a2, w_b2, b_b2)
    assert out_big.shape == (b2, s2, dout2)
    assert jnp.allclose(out_big, ref_big, atol=2e-3, rtol=2e-3), "multi-tile mismatch"

    print("KERNEL_OK")
</pallas_src>

<mosaic_0001>
module attributes {stable_mosaic.version = 11 : i64} {
  func.func @_lora_a_kernel(%arg0: i32, %arg1: i32, %arg2: memref<16x32xf32, #tpu.memory_space<vmem>>, %arg3: memref<32x128xf32, #tpu.memory_space<vmem>>, %arg4: memref<1x128xf32, #tpu.memory_space<vmem>>, %arg5: memref<16x128xf32, #tpu.memory_space<vmem>>, %arg6: memref<16x128xf32, #tpu.memory_space<vmem>>) attributes {dimension_semantics = [#tpu.dimension_semantics<parallel>, #tpu.dimension_semantics<arbitrary>], iteration_bounds = array<i64: 1, 1>, scalar_prefetch = 0 : i64, scratch_operands = 1 : i64, tpu.core_type = #tpu.core_type<tc>, window_params = [{transform_indices = @transform_0, window_bounds = array<i64: 16, 32>}, {transform_indices = @transform_1, window_bounds = array<i64: 32, 128>}, {pipeline_mode = #tpu.pipeline_mode<synchronous>, transform_indices = @transform_2, window_bounds = array<i64: 1, 128>}, {transform_indices = @transform_3, window_bounds = array<i64: 16, 128>}]} {
    %c0_i32 = arith.constant 0 : i32
    %0 = arith.cmpi eq, %arg1, %c0_i32 : i32
    %1 = arith.extui %0 : i1 to i32
    %c0_i32_0 = arith.constant 0 : i32
    %2 = arith.cmpi ne, %1, %c0_i32_0 : i32
    scf.if %2 {
      %cst_10 = arith.constant 0.000000e+00 : f32
      %12 = vector.broadcast %cst_10 : f32 to vector<16x128xf32>
      %c0_11 = arith.constant 0 : index
      %c0_12 = arith.constant 0 : index
      %13 = vector.load %arg6[%c0_11, %c0_12] : memref<16x128xf32, #tpu.memory_space<vmem>>, vector<16x128xf32>
      tpu.vector_store %arg6[%c0_11, %c0_12], %12 {strides = array<i32>} : memref<16x128xf32, #tpu.memory_space<vmem>>, vector<16x128xf32>,
    } else {
    }
    %c0 = arith.constant 0 : index
    %c0_1 = arith.constant 0 : index
    %3 = vector.load %arg6[%c0, %c0_1] : memref<16x128xf32, #tpu.memory_space<vmem>>, vector<16x128xf32>
    %c0_2 = arith.constant 0 : index
    %c0_3 = arith.constant 0 : index
    %4 = vector.load %arg2[%c0_2, %c0_3] : memref<16x32xf32, #tpu.memory_space<vmem>>, vector<16x32xf32>
    %c0_4 = arith.constant 0 : index
    %c0_5 = arith.constant 0 : index
    %5 = vector.load %arg3[%c0_4, %c0_5] : memref<32x128xf32, #tpu.memory_space<vmem>>, vector<32x128xf32>
    %cst = arith.constant dense<0.000000e+00> : vector<16x128xf32>
    %6 = tpu.matmul %4, %5, %cst {dimension_numbers = #tpu.dot_dimension_numbers<[1], [0], [0], [1], [0, 0, 1, 1], [], []>} : vector<16x32xf32>, vector<32x128xf32>, vector<16x128xf32> -> vector<16x128xf32>
    %7 = arith.addf %3, %6 : vector<16x128xf32>
    %c0_6 = arith.constant 0 : index
    %c0_7 = arith.constant 0 : index
    %8 = vector.load %arg6[%c0_6, %c0_7] : memref<16x128xf32, #tpu.memory_space<vmem>>, vector<16x128xf32>
    tpu.vector_store %arg6[%c0_6, %c0_7], %7 {strides = array<i32>} : memref<16x128xf32, #tpu.memory_space<vmem>>, vector<16x128xf32>,
    %c0_i32_8 = arith.constant 0 : i32
    %9 = arith.cmpi eq, %arg1, %c0_i32_8 : i32
    %10 = arith.extui %9 : i1 to i32
    %c0_i32_9 = arith.constant 0 : i32
    %11 = arith.cmpi ne, %10, %c0_i32_9 : i32
    scf.if %11 {
      %c0_10 = arith.constant 0 : index
      %c0_11 = arith.constant 0 : index
      %12 = vector.load %arg6[%c0_10, %c0_11] : memref<16x128xf32, #tpu.memory_space<vmem>>, vector<16x128xf32>
      %c0_12 = arith.constant 0 : index
      %c0_13 = arith.constant 0 : index
      %13 = vector.load %arg4[%c0_12, %c0_13] : memref<1x128xf32, #tpu.memory_space<vmem>>, vector<1x128xf32>
      %14 = vector.broadcast %13 : vector<1x128xf32> to vector<16x128xf32>
      %15 = arith.addf %12, %14 : vector<16x128xf32>
      %c0_14 = arith.constant 0 : index
      %c0_15 = arith.constant 0 : index
      %16 = vector.load %arg5[%c0_14, %c0_15] : memref<16x128xf32, #tpu.memory_space<vmem>>, vector<16x128xf32>
      tpu.vector_store %arg5[%c0_14, %c0_15], %15 {strides = array<i32>} : memref<16x128xf32, #tpu.memory_space<vmem>>, vector<16x128xf32>,
    } else {
    }
    return
  }
  func.func @transform_0(%arg0: i32, %arg1: i32) -> (i32, i32) {
    %c0_i32 = arith.constant 0 : i32
    return %arg0, %arg1 : i32, i32
  }
  func.func @transform_1(%arg0: i32, %arg1: i32) -> (i32, i32) {
    %c0_i32 = arith.constant 0 : i32
    %c0_i32_0 = arith.constant 0 : i32
    return %arg1, %c0_i32 : i32, i32
  }
  func.func @transform_2(%arg0: i32, %arg1: i32) -> (i32, i32) {
    %c0_i32 = arith.constant 0 : i32
    %c0_i32_0 = arith.constant 0 : i32
    %c0_i32_1 = arith.constant 0 : i32
    return %c0_i32, %c0_i32_0 : i32, i32
  }
  func.func @transform_3(%arg0: i32, %arg1: i32) -> (i32, i32) {
    %c0_i32 = arith.constant 0 : i32
    %c0_i32_0 = arith.constant 0 : i32
    return %arg0, %c0_i32 : i32, i32
  }
}

module attributes {stable_mosaic.version = 11 : i64} {
  func.func @_lora_linear_kernel(%arg0: i32, %arg1: i32, %arg2: i32, %arg3: memref<16x32xf32, #tpu.memory_space<vmem>>, %arg4: memref<32x32xf32, #tpu.memory_space<vmem>>, %arg5: memref<16x128xf32, #tpu.memory_space<vmem>>, %arg6: memref<128x32xf32, #tpu.memory_space<vmem>>, %arg7: memref<1x32xf32, #tpu.memory_space<vmem>>, %arg8: memref<16x32xf32, #tpu.memory_space<vmem>>, %arg9: memref<16x32xf32, #tpu.memory_space<vmem>>) attributes {dimension_semantics = [#tpu.dimension_semantics<parallel>, #tpu.dimension_semantics<parallel>, #tpu.dimension_semantics<arbitrary>], iteration_bounds = array<i64: 1, 1, 1>, scalar_prefetch = 0 : i64, scratch_operands = 1 : i64, tpu.core_type = #tpu.core_type<tc>, window_params = [{transform_indices = @transform_0, window_bounds = array<i64: 16, 32>}, {transform_indices = @transform_1, window_bounds = array<i64: 32, 32>}, {transform_indices = @transform_2, window_bounds = array<i64: 16, 128>}, {transform_indices = @transform_3, window_bounds = array<i64: 128, 32>}, {transform_indices = @transform_4, window_bounds = array<i64: 1, 32>}, {transform_indices = @transform_5, window_bounds = array<i64: 16, 32>}]} {
    %c0_i32 = arith.constant 0 : i32
    %0 = arith.cmpi eq, %arg2, %c0_i32 : i32
    %1 = arith.extui %0 : i1 to i32
    %c0_i32_0 = arith.constant 0 : i32
    %2 = arith.cmpi ne, %1, %c0_i32_0 : i32
    scf.if %2 {
      %cst_10 = arith.constant 0.000000e+00 : f32
      %12 = vector.broadcast %cst_10 : f32 to vector<16x32xf32>
      %c0_11 = arith.constant 0 : index
      %c0_12 = arith.constant 0 : index
      %13 = vector.load %arg9[%c0_11, %c0_12] : memref<16x32xf32, #tpu.memory_space<vmem>>, vector<16x32xf32>
      tpu.vector_store %arg9[%c0_11, %c0_12], %12 {strides = array<i32>} : memref<16x32xf32, #tpu.memory_space<vmem>>, vector<16x32xf32>,
    } else {
    }
    %c0 = arith.constant 0 : index
    %c0_1 = arith.constant 0 : index
    %3 = vector.load %arg9[%c0, %c0_1] : memref<16x32xf32, #tpu.memory_space<vmem>>, vector<16x32xf32>
    %c0_2 = arith.constant 0 : index
    %c0_3 = arith.constant 0 : index
    %4 = vector.load %arg3[%c0_2, %c0_3] : memref<16x32xf32, #tpu.memory_space<vmem>>, vector<16x32xf32>
    %c0_4 = arith.constant 0 : index
    %c0_5 = arith.constant 0 : index
    %5 = vector.load %arg4[%c0_4, %c0_5] : memref<32x32xf32, #tpu.memory_space<vmem>>, vector<32x32xf32>
    %cst = arith.constant dense<0.000000e+00> : vector<16x32xf32>
    %6 = tpu.matmul %4, %5, %cst {dimension_numbers = #tpu.dot_dimension_numbers<[1], [0], [0], [1], [0, 0, 1, 1], [], []>} : vector<16x32xf32>, vector<32x32xf32>, vector<16x32xf32> -> vector<16x32xf32>
    %7 = arith.addf %3, %6 : vector<16x32xf32>
    %c0_6 = arith.constant 0 : index
    %c0_7 = arith.constant 0 : index
    %8 = vector.load %arg9[%c0_6, %c0_7] : memref<16x32xf32, #tpu.memory_space<vmem>>, vector<16x32xf32>
    tpu.vector_store %arg9[%c0_6, %c0_7], %7 {strides = array<i32>} : memref<16x32xf32, #tpu.memory_space<vmem>>, vector<16x32xf32>,
    %c0_i32_8 = arith.constant 0 : i32
    %9 = arith.cmpi eq, %arg2, %c0_i32_8 : i32
    %10 = arith.extui %9 : i1 to i32
    %c0_i32_9 = arith.constant 0 : i32
    %11 = arith.cmpi ne, %10, %c0_i32_9 : i32
    scf.if %11 {
      %c0_10 = arith.constant 0 : index
      %c0_11 = arith.constant 0 : index
      %12 = vector.load %arg9[%c0_10, %c0_11] : memref<16x32xf32, #tpu.memory_space<vmem>>, vector<16x32xf32>
      %c0_12 = arith.constant 0 : index
      %c0_13 = arith.constant 0 : index
      %13 = vector.load %arg5[%c0_12, %c0_13] : memref<16x128xf32, #tpu.memory_space<vmem>>, vector<16x128xf32>
      %c0_14 = arith.constant 0 : index
      %c0_15 = arith.constant 0 : index
      %14 = vector.load %arg6[%c0_14, %c0_15] : memref<128x32xf32, #tpu.memory_space<vmem>>, vector<128x32xf32>
      %cst_16 = arith.constant dense<0.000000e+00> : vector<16x32xf32>
      %15 = tpu.matmul %13, %14, %cst_16 {dimension_numbers = #tpu.dot_dimension_numbers<[1], [0], [0], [1], [0, 0, 1, 1], [], []>} : vector<16x128xf32>, vector<128x32xf32>, vector<16x32xf32> -> vector<16x32xf32>
      %16 = arith.addf %12, %15 : vector<16x32xf32>
      %c0_17 = arith.constant 0 : index
      %c0_18 = arith.constant 0 : index
      %17 = vector.load %arg7[%c0_17, %c0_18] : memref<1x32xf32, #tpu.memory_space<vmem>>, vector<1x32xf32>
      %18 = vector.broadcast %17 : vector<1x32xf32> to vector<16x32xf32>
      %19 = arith.addf %16, %18 : vector<16x32xf32>
      %c0_19 = arith.constant 0 : index
      %c0_20 = arith.constant 0 : index
      %20 = vector.load %arg8[%c0_19, %c0_20] : memref<16x32xf32, #tpu.memory_space<vmem>>, vector<16x32xf32>
      tpu.vector_store %arg8[%c0_19, %c0_20], %19 {strides = array<i32>} : memref<16x32xf32, #tpu.memory_space<vmem>>, vector<16x32xf32>,
    } else {
    }
    return
  }
  func.func @transform_0(%arg0: i32, %arg1: i32, %arg2: i32) -> (i32, i32) {
    %c0_i32 = arith.constant 0 : i32
    return %arg0, %arg2 : i32, i32
  }
  func.func @transform_1(%arg0: i32, %arg1: i32, %arg2: i32) -> (i32, i32) {
    %c0_i32 = arith.constant 0 : i32
    return %arg2, %arg1 : i32, i32
  }
  func.func @transform_2(%arg0: i32, %arg1: i32, %arg2: i32) -> (i32, i32) {
    %c0_i32 = arith.constant 0 : i32
    %c0_i32_0 = arith.constant 0 : i32
    return %arg0, %c0_i32 : i32, i32
  }
  func.func @transform_3(%arg0: i32, %arg1: i32, %arg2: i32) -> (i32, i32) {
    %c0_i32 = arith.constant 0 : i32
    %c0_i32_0 = arith.constant 0 : i32
    return %c0_i32, %arg1 : i32, i32
  }
  func.func @transform_4(%arg0: i32, %arg1: i32, %arg2: i32) -> (i32, i32) {
    %c0_i32 = arith.constant 0 : i32
    %c0_i32_0 = arith.constant 0 : i32
    return %c0_i32, %arg1 : i32, i32
  }
  func.func @transform_5(%arg0: i32, %arg1: i32, %arg2: i32) -> (i32, i32) {
    %c0_i32 = arith.constant 0 : i32
    return %arg0, %arg1 : i32, i32
  }
}

</mosaic_0001>

<bundles_post_ra>
// kernel: lora_linear.3
= control target key start
LH: loop header
LB: loop body
LE: loop exit
PB: predicated region body
PF: predicated region fallthrough
CT: control target
= control target key end

     0   :  { %vm25_vm0 = vcmask 261120   ;;  %v193_v2 = vmov 0.0   ;;  %s313_s0 = inlined_call_operand.vmem [shape: f32[16,32], index: 0, kind: input, shape index: {}]   ;;  %s314_s1 = inlined_call_operand.vmem [shape: f32[32,32], index: 1, kind: input, shape index: {}]   ;;  %s315_s2 = inlined_call_operand.vmem [shape: f32[16,128], index: 2, kind: input, shape index: {}]   ;;  %s316_s3 = inlined_call_operand.vmem [shape: f32[128,32], index: 3, kind: input, shape index: {}]   ;;  %s317_s4 = inlined_call_operand.vmem [shape: f32[1,32], index: 4, kind: input, shape index: {}]   ;;  %s318_s5 = inlined_call_operand.hbm [shape: f32[16,32], index: 5, kind: output, shape index: {}]  }
   0x1   :  { %v92_v0 = vld [vmem:[%s316_s3 + $0x78] sm:$0xff]  ;;  %v91_v1 = vld [vmem:[%s316_s3 + $0x70] sm:$0xff]  ;;  %26 = vst.msk [vmem:[#allocation2] sm:$0xff] %vm25_vm0, %v193_v2  ;;  %v90_v3 = vld [vmem:[%s316_s3 + $0x68] sm:$0xff] }
   0x2   :  { %93 = vmatpush.msra.mxu1 %v92_v0  ;;  %146 = vmatpush.msra.mxu2 %v92_v0  ;;  %v35_v4 = vld [vmem:[%s314_s1 + $0x18] sm:$0xff]  ;;  %27 = vst.msk [vmem:[#allocation2 + $0x8] sm:$0xff] %vm25_vm0, %v193_v2  ;;  %v34_v5 = vld [vmem:[%s314_s1 + $0x10] sm:$0xff]  ;;  %v89_v6 = vld [vmem:[%s316_s3 + $0x60] sm:$0xff] }
   0x3   :  { %55 = vmatpush.msra.mxu0 %v35_v4  ;;  %v33_v7 = vld [vmem:[%s314_s1 + $0x8] sm:$0xff]  ;;  %v88_v8 = vld [vmem:[%s316_s3 + $0x58] sm:$0xff]  ;;  %v32_v9 = vld [vmem:[%s314_s1] sm:$0xff] }
   0x4   :  { %94 = vmatpush.msra.mxu1 %v91_v1  ;;  %147 = vmatpush.msra.mxu2 %v91_v1  ;;  %v87_v10 = vld [vmem:[%s316_s3 + $0x50] sm:$0xff] }
   0x5   :  { %56 = vmatpush.msra.mxu0 %v34_v5 }
   0x6   :  { %95 = vmatpush.msra.mxu1 %v90_v3  ;;  %148 = vmatpush.msra.mxu2 %v90_v3 }
   0x7   :  { %57 = vmatpush.msra.mxu0 %v33_v7 }
   0x8   :  { %96 = vmatpush.msra.mxu1 %v89_v6  ;;  %149 = vmatpush.msra.mxu2 %v89_v6 }
   0x9   :  { %10 = vsyncpa [#allocation4], 0  ;;  %v30_v11 = vld [vmem:[%s313_s0] sm:$0xff]  ;;  %v86_v12 = vld [vmem:[%s316_s3 + $0x48] sm:$0xff]  ;;  %58 = vmatpush.msra.mxu0 %v32_v9  ;;  %s132_s17 = sshll.u32 %s318_s5, 4  ;;  %s196_s18 = smov 8   ;;  %s133_s17 = int_to_ptr.hbm [resolvable:$true] %s132_s17 }
   0xa   :  { %97 = vmatpush.msra.mxu1 %v88_v8  ;;  %150 = vmatpush.msra.mxu2 %v88_v8  ;;  %v85_v13 = vld [vmem:[%s316_s3 + $0x40] sm:$0xff]  ;;  %v84_v14 = vld [vmem:[%s316_s3 + $0x38] sm:$0xff]  ;;  %v83_v15 = vld [vmem:[%s316_s3 + $0x30] sm:$0xff] }
   0xb   :  { %144 = vmatmul.msk.f32.vlgmr.msra.gmra.mxu0 %vm25_vm0, %v30_v11  ;;  %v31_v16 = vld [vmem:[%s313_s0 + $0x8] sm:$0xff]  ;;  %v81_v18 = vld [vmem:[%s316_s3 + $0x20] sm:$0xff]  ;;  %v80_v19 = vld [vmem:[%s316_s3 + $0x18] sm:$0xff] }
   0xc   :  { %98 = vmatpush.msra.mxu1 %v87_v10  ;;  %151 = vmatpush.msra.mxu2 %v87_v10  ;;  %v82_v17 = vld [vmem:[%s316_s3 + $0x28] sm:$0xff]  ;;  %v79_v20 = vld [vmem:[%s316_s3 + $0x10] sm:$0xff]  ;;  %v77_v22 = vld [vmem:[%s316_s3] sm:$0xff] }
   0xd   :  { %v78_v21 = vld [vmem:[%s316_s3 + $0x8] sm:$0xff]  ;;  %v75_v23 = vld [vmem:[%s315_s2] sm:$0xff] }
   0xe   :  { %99 = vmatpush.msra.mxu1 %v86_v12  ;;  %152 = vmatpush.msra.mxu2 %v86_v12  ;;  %v76_v24 = vld [vmem:[%s315_s2 + $0x8] sm:$0xff]  ;;  %v28_v25 = vld [vmem:[#allocation2] sm:$0xff]  ;;  %s194_s2 = smov [#allocation3]  }
   0xf   :  { %v29_v28 = vld [vmem:[#allocation2 + $0x8] sm:$0xff]  ;;  %v166_v31 = vld [vmem:[%s317_s4] ss:$0 sm:$0xff]  ;;  %s130_s15 = sshll.u32 %s194_s2, 4  ;;  %s195_s4 = smov 128   ;;  %s131_s15 = int_to_ptr.vmem [resolvable:$true] %s130_s15 }
  0x10   :  { %100 = vmatpush.msra.mxu1 %v85_v13  ;;  %153 = vmatpush.msra.mxu2 %v85_v13 }
  0x12   :  { %101 = vmatpush.msra.mxu1 %v84_v14  ;;  %154 = vmatpush.msra.mxu2 %v84_v14 }
  0x13   :  { %145 = vmatmul.msk.f32.gmra.mxu0 %vm25_vm0, %v31_v16 }
  0x14   :  { %102 = vmatpush.msra.mxu1 %v83_v15  ;;  %155 = vmatpush.msra.mxu2 %v83_v15 }
  0x16   :  { %103 = vmatpush.msra.mxu1 %v82_v17  ;;  %156 = vmatpush.msra.mxu2 %v82_v17 }
  0x18   :  { %104 = vmatpush.msra.mxu1 %v81_v18  ;;  %157 = vmatpush.msra.mxu2 %v81_v18 }
  0x1a   :  { %105 = vmatpush.msra.mxu1 %v80_v19  ;;  %158 = vmatpush.msra.mxu2 %v80_v19 }
  0x1c   :  { %106 = vmatpush.msra.mxu1 %v79_v20  ;;  %159 = vmatpush.msra.mxu2 %v79_v20 }
  0x1e   :  { %107 = vmatpush.msra.mxu1 %v78_v21  ;;  %160 = vmatpush.msra.mxu2 %v78_v21 }
  0x20   :  { %108 = vmatpush.msra.mxu1 %v77_v22  ;;  %161 = vmatpush.msra.mxu2 %v77_v22 }
  0x21   :  { %109 = vmatmul.f32.vlgmr.msra.gmra.mxu1 %v75_v23  ;;  %112 = vmatmul.f32.vlgmr.msra.gmra.mxu2 %v76_v24 }
  0x88   :  { %v60_v26 = vpop.f32.mrf.mxu0 }
  0x89   :  { %v66_v27 = vadd.f32 %v60_v26, %v28_v25 }
  0x8b   :  { %68 = vst.msk [vmem:[#allocation2] sm:$0xff] %vm25_vm0, %v66_v27 }
  0x90   :  { %v63_v29 = vpop.f32.mrf.mxu0 }
  0x91   :  { %v67_v30 = vadd.f32 %v63_v29, %v29_v28 }
  0x92   :  { %v73_v32 = vld [vmem:[#allocation2] sm:$0xff] }
  0x93   :  { %69 = vst.msk [vmem:[#allocation2 + $0x8] sm:$0xff] %vm25_vm0, %v67_v30 }
  0x9a   :  { %v74_v36 = vld [vmem:[#allocation2 + $0x8] sm:$0xff] }
  0x9e   :  { %v110_v33 = vpop.f32.mrf.mxu1 }
  0x9f   :  { %v116_v34 = vadd.f32 %v110_v33, %v73_v32 }
  0xa1   :  { %v122_v35 = vadd.f32 %v166_v31, %v116_v34 }
  0xa3   :  { %124 = vst.msk [vmem:[#allocation3] sm:$0xff] %vm25_vm0, %v122_v35 }
  0xa4   :  { %v113_v37 = vpop.f32.mrf.mxu2 }
  0xa5   :  { %v117_v38 = vadd.f32 %v113_v37, %v74_v36 }
  0xa7   :  { %v123_v39 = vadd.f32 %v166_v31, %v117_v38 }
  0xa9   :  { %125 = vst.msk [vmem:[#allocation3 + $0x8] sm:$0xff] %vm25_vm0, %v123_v39 }
  0xaa   :  { %138 = dma.vmem_to_hbm [thread:$0]  %s131_s15, 256, %s133_s17, [#allocation4], %s195_s4, %s195_s4, %s196_s18  }
  0xab   :  { %191 = dma.done.wait [#allocation4], 256  }
  0xac   :  { %192 = vsyncadd [#allocation4], 4294967040 }
  0xad   :  { %143 = vsyncpa [#allocation4], 1 }

// kernel: lora_linear.2
= control target key start
LH: loop header
LB: loop body
LE: loop exit
PB: predicated region body
PF: predicated region fallthrough
CT: control target
= control target key end

     0   :  { %8 = vsyncpa [#allocation4], 0  ;;  %s215_s0 = inlined_call_operand.hbm [shape: f32[16,32], index: 0, kind: input, shape index: {}]   ;;  %s216_s1 = inlined_call_operand.hbm [shape: f32[32,128], index: 1, kind: input, shape index: {}]   ;;  %s217_s2 = inlined_call_operand.vmem [shape: f32[1,128], index: 2, kind: input, shape index: {}]   ;;  %s218_s3 = inlined_call_operand.vmem [shape: f32[16,128], index: 3, kind: output, shape index: {}]  }
   0x1   :  { %s14_s14 = sshll.u32 %s215_s0, 4  ;;  %s15_s14 = int_to_ptr.hbm [resolvable:$true] %s14_s14 }
   0x2   :  { %9 = vsyncpa [#allocation6], 0  ;;  %s176_s15 = smov [#allocation3]   ;;  %s27_s19 = sshll.u32 %s216_s1, 4  ;;  %s28_s19 = int_to_ptr.hbm [resolvable:$true] %s27_s19 }
   0x3   :  { %s16_s16 = sshll.u32 %s176_s15, 4  ;;  %s177_s20 = smov 128   ;;  %s17_s16 = int_to_ptr.vmem [resolvable:$true] %s16_s16 }
   0x4   :  { %s178_s21 = smov 8   ;;  %s179_s22 = smov [#allocation5]  }
   0x5   :  { %22 = dma.hbm_to_vmem [thread:$0]  %s15_s14, 256, %s17_s16, [#allocation4], %s177_s20, %s177_s20, %s178_s21  }
   0x6   :  { %s29_s23 = sshll.u32 %s179_s22, 4  ;;  %s30_s23 = int_to_ptr.vmem [resolvable:$true] %s29_s23 }
   0x7   :  { %35 = dma.hbm_to_vmem [thread:$0]  %s28_s19, 512, %s30_s23, [#allocation6], %s177_s20, %s177_s20, %s178_s21  }
   0x8   :  { %172 = dma.done.wait [#allocation4], 256  }
   0x9   :  { %173 = vsyncadd [#allocation4], 4294967040 }
   0xa   :  { %174 = dma.done.wait [#allocation6], 512  }
   0xb   :  { %175 = vsyncadd [#allocation6], 4294966784  ;;  %v59_v0 = vld [vmem:[#allocation5 + $0x18] sm:$0xff]  ;;  %v58_v1 = vld [vmem:[#allocation5 + $0x10] sm:$0xff]  ;;  %vm60_vm0 = vcmask 261120  }
   0xc   :  { %79 = vmatpush.msra.mxu0 %v59_v0  ;;  %115 = vmatpush.msra.mxu1 %v59_v0  ;;  %v57_v2 = vld [vmem:[#allocation5 + $0x8] sm:$0xff]  ;;  %v56_v3 = vld [vmem:[#allocation5] sm:$0xff]  ;;  %v54_v4 = vld [vmem:[#allocation3] sm:$0xff] }
   0xd   :  { %v55_v5 = vld [vmem:[#allocation3 + $0x8] sm:$0xff]  ;;  %v123_v6 = vld [vmem:[%s217_s2] ss:$0 sm:$0xff] }
   0xe   :  { %80 = vmatpush.msra.mxu0 %v58_v1  ;;  %116 = vmatpush.msra.mxu1 %v58_v1 }
  0x10   :  { %81 = vmatpush.msra.mxu0 %v57_v2  ;;  %117 = vmatpush.msra.mxu1 %v57_v2 }
  0x12   :  { %82 = vmatpush.msra.mxu0 %v56_v3  ;;  %118 = vmatpush.msra.mxu1 %v56_v3 }
  0x13   :  { %113 = vmatmul.msk.f32.vlgmr.msra.gmra.mxu0 %vm60_vm0, %v54_v4  ;;  %114 = vmatmul.msk.f32.vlgmr.msra.gmra.mxu1 %vm60_vm0, %v55_v5 }
  0x90   :  { %v84_v7 = vpop.f32.mrf.mxu0  ;;  %v87_v8 = vpop.f32.mrf.mxu1 }
  0x91   :  { %v103_v9 = vadd.f32 %v123_v6, %v84_v7  ;;  %v104_v10 = vadd.f32 %v123_v6, %v87_v8 }
  0x93   :  { %105 = vst [vmem:[%s218_s3] sm:$0xff] %v103_v9 }
  0x94   :  { %106 = vst [vmem:[%s218_s3 + $0x8] sm:$0xff] %v104_v10 }
  0x95   :  { %111 = vsyncpa [#allocation4], 1 }
  0x96   :  { %112 = vsyncpa [#allocation6], 1 }

</bundles_post_ra>
